<compile_context>
chip_gen: v5e
topology: v5e:2x2
jax: 0.10.0
libtpu: 0.0.40
codegen_flags: <defaults>
</compile_context>

<pallas_src>
import jax
import jax.numpy as jnp
from jax.experimental import pallas as pl
from jax.experimental.pallas import tpu as pltpu


NEG_SLOPE = 0.01  # torch.nn.LeakyReLU default
BN_EPS = 1e-5     # torch.nn.BatchNorm1d default


def _leaky_relu(x):
    return jnp.where(x >= 0, x, NEG_SLOPE * x)


# -----------------------------------------------------------------------------
# One-time feature probe (narrow, import-time) for pipeline_mode=pl.Buffered(1).
# Grid-invariant weights get single-buffered when supported; no broad runtime
# except that could mask genuine compile / VMEM-OOM errors.
# -----------------------------------------------------------------------------
def _probe_buffered():
    try:
        pl.BlockSpec((8, 128), lambda i: (0, 0), pipeline_mode=pl.Buffered(1))
        return True
    except (AttributeError, TypeError):
        return False


_HAS_BUFFERED = _probe_buffered()


def _vmem_budget_bytes():
    """Generation-aware VMEM budget: ~3/4 of physical VMEM.

    ≈48 MiB on v7x (64 MiB physical, headroom for internal scratch), ≈96 MiB on
    v5e/v6e (128 MiB physical). Conservative fallback if the query is unavailable.
    """
    try:
        cap = int(pltpu.get_tpu_info().vmem_capacity_bytes)
    except Exception:
        cap = 64 << 20
    return max(16 << 20, (cap * 3) // 4)


# -----------------------------------------------------------------------------
# Kernels
# -----------------------------------------------------------------------------
def mlp_fused_kernel(x_ref,
                     w1_ref, b1_ref, w2_ref, b2_ref, w3_ref, b3_ref,
                     wo_ref, bo_ref,
                     o_ref):
    """Fused 4-layer MLP for one batch tile; all operands resident in VMEM.

    BatchNorm is pre-folded into the weights/biases. x arrives already in the matmul
    dtype (bf16 by default) so the first dot consumes it directly; the MXU accumulates
    f32; bias add + LeakyReLU stay f32 (v5e VPU has no bf16); one cast back to the
    matmul dtype per layer feeds the next matmul.
    """
    h = x_ref[...]
    for w_ref, b_ref in ((w1_ref, b1_ref), (w2_ref, b2_ref), (w3_ref, b3_ref)):
        z = jnp.dot(h, w_ref[...], preferred_element_type=jnp.float32)
        z = _leaky_relu(z + b_ref[...])
        h = z.astype(w_ref.dtype)
    z = jnp.dot(h, wo_ref[...], preferred_element_type=jnp.float32) + bo_ref[...]
    o_ref[...] = z.astype(o_ref.dtype)


def _make_linear_kernel(apply_act):
    """Single Linear (+ optional LeakyReLU) kernel for the per-layer fallback path."""
    def linear_kernel(x_ref, w_ref, b_ref, o_ref):
        z = jnp.dot(x_ref[...], w_ref[...], preferred_element_type=jnp.float32)
        z = z + b_ref[...]
        if apply_act:
            z = _leaky_relu(z)
        o_ref[...] = z.astype(o_ref.dtype)
    return linear_kernel


# -----------------------------------------------------------------------------
# One-time parameter preparation (hoisted out of the forward)
# -----------------------------------------------------------------------------
def _round_up(n, m):
    return ((n + m - 1) // m) * m


def _fold_bn_into_linear(w, b, gamma, beta, mean, var):
    """PyTorch [out, in] Linear + eval-mode BN -> folded [in, out] weight, [out] bias."""
    s = gamma / jnp.sqrt(var + BN_EPS)      # [out]
    w_f = w.T * s[None, :]                  # [in, out]
    b_f = b * s + (beta - mean * s)         # [out]
    return w_f, b_f


def _pad_weight(w, rows, cols, dtype):
    return jnp.pad(w, ((0, rows - w.shape[0]), (0, cols - w.shape[1]))).astype(dtype)


def _pad_bias(b, cols):
    return jnp.pad(b, (0, cols - b.shape[0])).reshape(1, -1).astype(jnp.float32)


def prepare_params(params, *, matmul_dtype=jnp.bfloat16):
    """Fold eval-mode BN into the Linears, transpose, 128-pad and cast. Run ONCE."""
    dim_in = params["w1"].shape[1]
    n1, n2, n3 = (params[k].shape[0] for k in ("w1", "w2", "w3"))
    dim_out = params["wo"].shape[0]

    w1, b1 = _fold_bn_into_linear(params["w1"], params["b1"], params["bn1_g"],
                                  params["bn1_b"], params["bn1_m"], params["bn1_v"])
    w2, b2 = _fold_bn_into_linear(params["w2"], params["b2"], params["bn2_g"],
                                  params["bn2_b"], params["bn2_m"], params["bn2_v"])
    w3, b3 = _fold_bn_into_linear(params["w3"], params["b3"], params["bn3_g"],
                                  params["bn3_b"], params["bn3_m"], params["bn3_v"])
    wo, bo = params["wo"].T, params["bo"]

    dpi, dp1, dp2, dp3, dpo = (_round_up(d, 128)
                               for d in (dim_in, n1, n2, n3, dim_out))
    weights = (
        _pad_weight(w1, dpi, dp1, matmul_dtype), _pad_bias(b1, dp1),
        _pad_weight(w2, dp1, dp2, matmul_dtype), _pad_bias(b2, dp2),
        _pad_weight(w3, dp2, dp3, matmul_dtype), _pad_bias(b3, dp3),
        _pad_weight(wo, dp3, dpo, matmul_dtype), _pad_bias(bo, dpo),
    )
    return {
        "weights": weights,
        "padded_dims": (dpi, dp1, dp2, dp3, dpo),
        "matmul_dtype": matmul_dtype,
        "dim_in": dim_in,
        "dim_out": dim_out,
    }


# -----------------------------------------------------------------------------
# pallas_call wrappers
# -----------------------------------------------------------------------------
def _const_specs(arrays):
    """Grid-invariant operands: whole array every step; single-buffered if supported."""
    if _HAS_BUFFERED:
        return [pl.BlockSpec(a.shape, lambda i: (0, 0), pipeline_mode=pl.Buffered(1))
                for a in arrays]
    return [pl.BlockSpec(a.shape, lambda i: (0, 0)) for a in arrays]


def _fused_call(xp, weights, bt, dpo, out_dtype, vmem_limit):
    Bp, dpi = xp.shape
    dp1, dp2, dp3 = weights[0].shape[1], weights[2].shape[1], weights[4].shape[1]
    wb_bytes = sum(int(a.nbytes) for a in weights)
    out_bytes = Bp * dpo * jnp.dtype(out_dtype).itemsize
    flops = 2 * Bp * (dpi * dp1 + dp1 * dp2 + dp2 * dp3 + dp3 * dpo)
    cost = pl.CostEstimate(flops=int(flops), transcendentals=0,
                           bytes_accessed=int(xp.nbytes) + out_bytes + wb_bytes)
    return pl.pallas_call(
        mlp_fused_kernel,
        out_shape=jax.ShapeDtypeStruct((Bp, dpo), out_dtype),
        grid_spec=pltpu.PrefetchScalarGridSpec(
            num_scalar_prefetch=0,
            grid=(Bp // bt,),
            in_specs=[pl.BlockSpec((bt, dpi), lambda i: (i, 0))] + _const_specs(weights),
            out_specs=pl.BlockSpec((bt, dpo), lambda i: (i, 0)),
        ),
        compiler_params=pltpu.CompilerParams(
            dimension_semantics=("parallel",),        # megacore split on v7x
            vmem_limit_bytes=int(vmem_limit),
        ),
        cost_estimate=cost,
    )(xp, *weights)


def _layer_call(h, w, b, bt, apply_act, out_dtype, budget):
    """One Linear(+act) pallas_call -- used when whole-weight residency won't fit."""
    Bp, din = h.shape
    dout = w.shape[1]
    w_mult = 1 if _HAS_BUFFERED else 2
    need = (2 * bt * (din * h.dtype.itemsize + dout * jnp.dtype(out_dtype).itemsize)
            + w_mult * (int(w.nbytes) + int(b.nbytes))
            + 2 * bt * dout * 4 + (2 << 20))
    vmem_limit = min(budget, max(16 << 20, need))
    cost = pl.CostEstimate(
        flops=int(2 * Bp * din * dout), transcendentals=0,
        bytes_accessed=int(h.nbytes) + int(w.nbytes) + int(b.nbytes)
        + Bp * dout * jnp.dtype(out_dtype).itemsize)
    return pl.pallas_call(
        _make_linear_kernel(apply_act),
        out_shape=jax.ShapeDtypeStruct((Bp, dout), out_dtype),
        grid_spec=pltpu.PrefetchScalarGridSpec(
            num_scalar_prefetch=0,
            grid=(Bp // bt,),
            in_specs=[pl.BlockSpec((bt, din), lambda i: (i, 0))] + _const_specs((w, b)),
            out_specs=pl.BlockSpec((bt, dout), lambda i: (i, 0)),
        ),
        compiler_params=pltpu.CompilerParams(
            dimension_semantics=("parallel",),
            vmem_limit_bytes=int(vmem_limit),
        ),
        cost_estimate=cost,
    )(h, w, b)


def mlp_forward(x, prepared, *, batch_tile=None, out_dtype=jnp.float32,
                force_layerwise=False):
    """x: [B, dim_in] float32. prepared: output of prepare_params()."""
    B, dim_in = x.shape
    assert dim_in == prepared["dim_in"]
    weights = prepared["weights"]
    dpi, dp1, dp2, dp3, dpo = prepared["padded_dims"]
    matmul_dtype = prepared["matmul_dtype"]
    dim_out = prepared["dim_out"]

    budget = _vmem_budget_bytes()
    if batch_tile is None:
        # 1024 where VMEM is plentiful (v5e/v6e: 128 MiB), 512 under v7x's 64 MiB.
        batch_tile = 1024 if budget >= (80 << 20) else 512

    # Batch tile: sublane multiple (16 for bf16 packing, 8 for f32); zero-padded batch.
    sublane = 16 if jnp.dtype(matmul_dtype).itemsize < 4 else 8
    bt = _round_up(min(batch_tile, max(B, sublane)), sublane)
    Bp = _round_up(B, bt)
    if Bp // bt == 1 and bt >= 2 * sublane:
        # >= 2 grid steps when the batch allows: pipelined x DMA / writeback, and the
        # "parallel" axis can actually engage both TensorCores on v7x.
        bt = _round_up(bt // 2, sublane)
        Bp = _round_up(B, bt)

    # Input DMA'd in the matmul dtype (halves x HBM->VMEM bytes for bf16).
    xp = jnp.pad(x, ((0, Bp - B), (0, dpi - dim_in))).astype(matmul_dtype)

    itm = jnp.dtype(matmul_dtype).itemsize
    oitm = jnp.dtype(out_dtype).itemsize
    wb_bytes = sum(int(a.nbytes) for a in weights)
    fused_need = (2 * bt * (dpi * itm + dpo * oitm)               # x/out double buffers
                  + (1 if _HAS_BUFFERED else 2) * wb_bytes        # resident weights
                  + 3 * bt * max(dp1, dp2, dp3, dpo) * 4          # f32 temporaries
                  + (2 << 20))                                    # slack

    if force_layerwise or fused_need > budget:
        # Whole-weight residency does not fit the budget (e.g. large nbase on v7x's
        # 64 MiB VMEM): run one pallas_call per layer, only that layer resident.
        layer_ops = [(weights[0], weights[1], True),
                     (weights[2], weights[3], True),
                     (weights[4], weights[5], True),
                     (weights[6], weights[7], False)]
        h = xp
        for idx, (w, b, act) in enumerate(layer_ops):
            ldtype = out_dtype if idx == len(layer_ops) - 1 else matmul_dtype
            h = _layer_call(h, w, b, bt, act, ldtype, budget)
        out_padded = h
    else:
        vmem_limit = min(budget, max(16 << 20, fused_need))
        out_padded = _fused_call(xp, weights, bt, dpo, out_dtype, vmem_limit)

    return out_padded[:B, :dim_out]


# -----------------------------------------------------------------------------
# Reference model + init (for the self-test)
# -----------------------------------------------------------------------------
def init_params(key, dim_in, nbase, dim_out):
    """Deterministic init mimicking PyTorch Linear default (U[-1/sqrt(fan_in), +])."""
    dims = [dim_in, nbase, nbase // 2, nbase // 4, dim_out]
    keys = jax.random.split(key, 8)
    params = {}
    names = [("w1", "b1"), ("w2", "b2"), ("w3", "b3"), ("wo", "bo")]
    for li, (wn, bn) in enumerate(names):
        fan_in, fan_out = dims[li], dims[li + 1]
        bound = 1.0 / jnp.sqrt(fan_in)
        params[wn] = jax.random.uniform(keys[2 * li], (fan_out, fan_in),
                                        jnp.float32, -bound, bound)
        params[bn] = jax.random.uniform(keys[2 * li + 1], (fan_out,),
                                        jnp.float32, -bound, bound)
    for i, d in enumerate([nbase, nbase // 2, nbase // 4], start=1):
        params[f"bn{i}_g"] = jnp.ones((d,), jnp.float32)
        params[f"bn{i}_b"] = jnp.zeros((d,), jnp.float32)
        params[f"bn{i}_m"] = jnp.zeros((d,), jnp.float32)
        params[f"bn{i}_v"] = jnp.ones((d,), jnp.float32)
    return params


def reference_forward(x, params):
    """Plain JAX reference (eval-mode BN)."""
    def bn(h, g, b, m, v):
        return (h - m) / jnp.sqrt(v + BN_EPS) * g + b

    h = x @ params["w1"].T + params["b1"]
    h = _leaky_relu(bn(h, params["bn1_g"], params["bn1_b"], params["bn1_m"], params["bn1_v"]))
    h = h @ params["w2"].T + params["b2"]
    h = _leaky_relu(bn(h, params["bn2_g"], params["bn2_b"], params["bn2_m"], params["bn2_v"]))
    h = h @ params["w3"].T + params["b3"]
    h = _leaky_relu(bn(h, params["bn3_g"], params["bn3_b"], params["bn3_m"], params["bn3_v"]))
    return h @ params["wo"].T + params["bo"]


if __name__ == "__main__":
    # Small, module-consistent shapes: MLP(nbase=64, dim_in=32, dim_out=16).
    B, dim_in, nbase, dim_out = 16, 32, 64, 16

    key = jax.random.PRNGKey(0)
    k_x, k_p = jax.random.split(key)
    x = jax.random.normal(k_x, (B, dim_in), jnp.float32)
    params = init_params(k_p, dim_in, nbase, dim_out)
    ref = reference_forward(x, params)

    # f32-matmul fused path (tight check; 2-step pipelined grid).
    prep_f32 = prepare_params(params, matmul_dtype=jnp.float32)
    out_f32 = jax.block_until_ready(mlp_forward(x, prep_f32, batch_tile=8))
    assert out_f32.shape == (B, dim_out)
    assert jnp.allclose(out_f32, ref, atol=1e-3, rtol=1e-3), "f32 kernel mismatch vs reference"

    # bf16-matmul / f32-accumulate fused path (default for v6e/v7x); looser tolerance.
    prep_bf16 = prepare_params(params, matmul_dtype=jnp.bfloat16)
    out_bf16 = jax.block_until_ready(mlp_forward(x, prep_bf16, batch_tile=16))
    assert out_bf16.shape == (B, dim_out)
    assert jnp.allclose(out_bf16, ref, atol=1e-1, rtol=5e-2), "bf16 kernel mismatch vs reference"

    # Per-layer fallback path (what v7x uses when the weight set exceeds its VMEM budget).
    out_lw = jax.block_until_ready(
        mlp_forward(x, prep_bf16, batch_tile=16, force_layerwise=True))
    assert out_lw.shape == (B, dim_out)
    assert jnp.allclose(out_lw, ref, atol=1e-1, rtol=5e-2), "layerwise kernel mismatch vs reference"

    print("KERNEL_OK")
</pallas_src>

<mosaic_0001>
module attributes {stable_mosaic.version = 11 : i64} {
  func.func @mlp_fused_kernel(%arg0: i32, %arg1: memref<8x128xf32, #tpu.memory_space<vmem>>, %arg2: memref<128x128xf32, #tpu.memory_space<vmem>>, %arg3: memref<1x128xf32, #tpu.memory_space<vmem>>, %arg4: memref<128x128xf32, #tpu.memory_space<vmem>>, %arg5: memref<1x128xf32, #tpu.memory_space<vmem>>, %arg6: memref<128x128xf32, #tpu.memory_space<vmem>>, %arg7: memref<1x128xf32, #tpu.memory_space<vmem>>, %arg8: memref<128x128xf32, #tpu.memory_space<vmem>>, %arg9: memref<1x128xf32, #tpu.memory_space<vmem>>, %arg10: memref<8x128xf32, #tpu.memory_space<vmem>>) attributes {dimension_semantics = [#tpu.dimension_semantics<parallel>], iteration_bounds = array<i64: 2>, scalar_prefetch = 0 : i64, scratch_operands = 0 : i64, tpu.core_type = #tpu.core_type<tc>, window_params = [{transform_indices = @transform_0, window_bounds = array<i64: 8, 128>}, {pipeline_mode = #tpu.pipeline_mode<synchronous>, transform_indices = @transform_1, window_bounds = array<i64: 128, 128>}, {pipeline_mode = #tpu.pipeline_mode<synchronous>, transform_indices = @transform_2, window_bounds = array<i64: 1, 128>}, {pipeline_mode = #tpu.pipeline_mode<synchronous>, transform_indices = @transform_3, window_bounds = array<i64: 128, 128>}, {pipeline_mode = #tpu.pipeline_mode<synchronous>, transform_indices = @transform_4, window_bounds = array<i64: 1, 128>}, {pipeline_mode = #tpu.pipeline_mode<synchronous>, transform_indices = @transform_5, window_bounds = array<i64: 128, 128>}, {pipeline_mode = #tpu.pipeline_mode<synchronous>, transform_indices = @transform_6, window_bounds = array<i64: 1, 128>}, {pipeline_mode = #tpu.pipeline_mode<synchronous>, transform_indices = @transform_7, window_bounds = array<i64: 128, 128>}, {pipeline_mode = #tpu.pipeline_mode<synchronous>, transform_indices = @transform_8, window_bounds = array<i64: 1, 128>}, {transform_indices = @transform_9, window_bounds = array<i64: 8, 128>}]} {
    %c0 = arith.constant 0 : index
    %c0_0 = arith.constant 0 : index
    %0 = vector.load %arg1[%c0, %c0_0] : memref<8x128xf32, #tpu.memory_space<vmem>>, vector<8x128xf32>
    %c0_1 = arith.constant 0 : index
    %c0_2 = arith.constant 0 : index
    %1 = vector.load %arg2[%c0_1, %c0_2] : memref<128x128xf32, #tpu.memory_space<vmem>>, vector<128x128xf32>
    %cst = arith.constant dense<0.000000e+00> : vector<8x128xf32>
    %2 = tpu.matmul %0, %1, %cst {dimension_numbers = #tpu.dot_dimension_numbers<[1], [0], [0], [1], [0, 0, 1, 1], [], []>} : vector<8x128xf32>, vector<128x128xf32>, vector<8x128xf32> -> vector<8x128xf32>
    %c0_3 = arith.constant 0 : index
    %c0_4 = arith.constant 0 : index
    %3 = vector.load %arg3[%c0_3, %c0_4] : memref<1x128xf32, #tpu.memory_space<vmem>>, vector<1x128xf32>
    %4 = vector.broadcast %3 : vector<1x128xf32> to vector<8x128xf32>
    %5 = arith.addf %2, %4 : vector<8x128xf32>
    %cst_5 = arith.constant 0.000000e+00 : f32
    %6 = vector.broadcast %cst_5 : f32 to vector<8x128xf32>
    %7 = arith.cmpf oge, %5, %6 : vector<8x128xf32>
    %cst_6 = arith.constant 0.00999999977 : f32
    %8 = vector.broadcast %cst_6 : f32 to vector<8x128xf32>
    %9 = arith.mulf %8, %5 : vector<8x128xf32>
    %10 = arith.select %7, %5, %9 : vector<8x128xi1>, vector<8x128xf32>
    %c0_7 = arith.constant 0 : index
    %c0_8 = arith.constant 0 : index
    %11 = vector.load %arg4[%c0_7, %c0_8] : memref<128x128xf32, #tpu.memory_space<vmem>>, vector<128x128xf32>
    %cst_9 = arith.constant dense<0.000000e+00> : vector<8x128xf32>
    %12 = tpu.matmul %10, %11, %cst_9 {dimension_numbers = #tpu.dot_dimension_numbers<[1], [0], [0], [1], [0, 0, 1, 1], [], []>} : vector<8x128xf32>, vector<128x128xf32>, vector<8x128xf32> -> vector<8x128xf32>
    %c0_10 = arith.constant 0 : index
    %c0_11 = arith.constant 0 : index
    %13 = vector.load %arg5[%c0_10, %c0_11] : memref<1x128xf32, #tpu.memory_space<vmem>>, vector<1x128xf32>
    %14 = vector.broadcast %13 : vector<1x128xf32> to vector<8x128xf32>
    %15 = arith.addf %12, %14 : vector<8x128xf32>
    %cst_12 = arith.constant 0.000000e+00 : f32
    %16 = vector.broadcast %cst_12 : f32 to vector<8x128xf32>
    %17 = arith.cmpf oge, %15, %16 : vector<8x128xf32>
    %cst_13 = arith.constant 0.00999999977 : f32
    %18 = vector.broadcast %cst_13 : f32 to vector<8x128xf32>
    %19 = arith.mulf %18, %15 : vector<8x128xf32>
    %20 = arith.select %17, %15, %19 : vector<8x128xi1>, vector<8x128xf32>
    %c0_14 = arith.constant 0 : index
    %c0_15 = arith.constant 0 : index
    %21 = vector.load %arg6[%c0_14, %c0_15] : memref<128x128xf32, #tpu.memory_space<vmem>>, vector<128x128xf32>
    %cst_16 = arith.constant dense<0.000000e+00> : vector<8x128xf32>
    %22 = tpu.matmul %20, %21, %cst_16 {dimension_numbers = #tpu.dot_dimension_numbers<[1], [0], [0], [1], [0, 0, 1, 1], [], []>} : vector<8x128xf32>, vector<128x128xf32>, vector<8x128xf32> -> vector<8x128xf32>
    %c0_17 = arith.constant 0 : index
    %c0_18 = arith.constant 0 : index
    %23 = vector.load %arg7[%c0_17, %c0_18] : memref<1x128xf32, #tpu.memory_space<vmem>>, vector<1x128xf32>
    %24 = vector.broadcast %23 : vector<1x128xf32> to vector<8x128xf32>
    %25 = arith.addf %22, %24 : vector<8x128xf32>
    %cst_19 = arith.constant 0.000000e+00 : f32
    %26 = vector.broadcast %cst_19 : f32 to vector<8x128xf32>
    %27 = arith.cmpf oge, %25, %26 : vector<8x128xf32>
    %cst_20 = arith.constant 0.00999999977 : f32
    %28 = vector.broadcast %cst_20 : f32 to vector<8x128xf32>
    %29 = arith.mulf %28, %25 : vector<8x128xf32>
    %30 = arith.select %27, %25, %29 : vector<8x128xi1>, vector<8x128xf32>
    %c0_21 = arith.constant 0 : index
    %c0_22 = arith.constant 0 : index
    %31 = vector.load %arg8[%c0_21, %c0_22] : memref<128x128xf32, #tpu.memory_space<vmem>>, vector<128x128xf32>
    %cst_23 = arith.constant dense<0.000000e+00> : vector<8x128xf32>
    %32 = tpu.matmul %30, %31, %cst_23 {dimension_numbers = #tpu.dot_dimension_numbers<[1], [0], [0], [1], [0, 0, 1, 1], [], []>} : vector<8x128xf32>, vector<128x128xf32>, vector<8x128xf32> -> vector<8x128xf32>
    %c0_24 = arith.constant 0 : index
    %c0_25 = arith.constant 0 : index
    %33 = vector.load %arg9[%c0_24, %c0_25] : memref<1x128xf32, #tpu.memory_space<vmem>>, vector<1x128xf32>
    %34 = vector.broadcast %33 : vector<1x128xf32> to vector<8x128xf32>
    %35 = arith.addf %32, %34 : vector<8x128xf32>
    %c0_26 = arith.constant 0 : index
    %c0_27 = arith.constant 0 : index
    %36 = vector.load %arg10[%c0_26, %c0_27] : memref<8x128xf32, #tpu.memory_space<vmem>>, vector<8x128xf32>
    tpu.vector_store %arg10[%c0_26, %c0_27], %35 {strides = array<i32>} : memref<8x128xf32, #tpu.memory_space<vmem>>, vector<8x128xf32>,
    return
  }
  func.func @transform_0(%arg0: i32) -> (i32, i32) {
    %c0_i32 = arith.constant 0 : i32
    %c0_i32_0 = arith.constant 0 : i32
    return %arg0, %c0_i32 : i32, i32
  }
  func.func @transform_1(%arg0: i32) -> (i32, i32) {
    %c0_i32 = arith.constant 0 : i32
    %c0_i32_0 = arith.constant 0 : i32
    %c0_i32_1 = arith.constant 0 : i32
    return %c0_i32, %c0_i32_0 : i32, i32
  }
  func.func @transform_2(%arg0: i32) -> (i32, i32) {
    %c0_i32 = arith.constant 0 : i32
    %c0_i32_0 = arith.constant 0 : i32
    %c0_i32_1 = arith.constant 0 : i32
    return %c0_i32, %c0_i32_0 : i32, i32
  }
  func.func @transform_3(%arg0: i32) -> (i32, i32) {
    %c0_i32 = arith.constant 0 : i32
    %c0_i32_0 = arith.constant 0 : i32
    %c0_i32_1 = arith.constant 0 : i32
    return %c0_i32, %c0_i32_0 : i32, i32
  }
  func.func @transform_4(%arg0: i32) -> (i32, i32) {
    %c0_i32 = arith.constant 0 : i32
    %c0_i32_0 = arith.constant 0 : i32
    %c0_i32_1 = arith.constant 0 : i32
    return %c0_i32, %c0_i32_0 : i32, i32
  }
  func.func @transform_5(%arg0: i32) -> (i32, i32) {
    %c0_i32 = arith.constant 0 : i32
    %c0_i32_0 = arith.constant 0 : i32
    %c0_i32_1 = arith.constant 0 : i32
    return %c0_i32, %c0_i32_0 : i32, i32
  }
  func.func @transform_6(%arg0: i32) -> (i32, i32) {
    %c0_i32 = arith.constant 0 : i32
    %c0_i32_0 = arith.constant 0 : i32
    %c0_i32_1 = arith.constant 0 : i32
    return %c0_i32, %c0_i32_0 : i32, i32
  }
  func.func @transform_7(%arg0: i32) -> (i32, i32) {
    %c0_i32 = arith.constant 0 : i32
    %c0_i32_0 = arith.constant 0 : i32
    %c0_i32_1 = arith.constant 0 : i32
    return %c0_i32, %c0_i32_0 : i32, i32
  }
  func.func @transform_8(%arg0: i32) -> (i32, i32) {
    %c0_i32 = arith.constant 0 : i32
    %c0_i32_0 = arith.constant 0 : i32
    %c0_i32_1 = arith.constant 0 : i32
    return %c0_i32, %c0_i32_0 : i32, i32
  }
  func.func @transform_9(%arg0: i32) -> (i32, i32) {
    %c0_i32 = arith.constant 0 : i32
    %c0_i32_0 = arith.constant 0 : i32
    return %arg0, %c0_i32 : i32, i32
  }
}

</mosaic_0001>

<bundles_post_ra>
// kernel: tpu_custom_call.1
= control target key start
LH: loop header
LB: loop body
LE: loop exit
PB: predicated region body
PF: predicated region fallthrough
CT: control target
= control target key end

     0   :  { %s1292_s0 = inlined_call_operand.hbm [shape: f32[16,128], index: 0, kind: input, shape index: {}]   ;;  %s1293_s1 = inlined_call_operand.hbm [shape: f32[128,128], index: 1, kind: input, shape index: {}]   ;;  %s1294_s2 = inlined_call_operand.vmem [shape: f32[1,128], index: 2, kind: input, shape index: {}]   ;;  %s1295_s3 = inlined_call_operand.hbm [shape: f32[128,128], index: 3, kind: input, shape index: {}]   ;;  %s1296_s4 = inlined_call_operand.vmem [shape: f32[1,128], index: 4, kind: input, shape index: {}]   ;;  %s1297_s5 = inlined_call_operand.hbm [shape: f32[128,128], index: 5, kind: input, shape index: {}]   ;;  %s1298_s6 = inlined_call_operand.vmem [shape: f32[1,128], index: 6, kind: input, shape index: {}]   ;;  %s1299_s7 = inlined_call_operand.hbm [shape: f32[128,128], index: 7, kind: input, shape index: {}]   ;;  %s1300_s8 = inlined_call_operand.vmem [shape: f32[1,128], index: 8, kind: input, shape index: {}]   ;;  %s1301_s9 = inlined_call_operand.hbm [shape: f32[16,128], index: 9, kind: output, shape index: {}]  }
   0x1   :  { %1302 = sst [smem:[#allocation16_spill]] %s1293_s1 }
   0x2   :  { %1303 = sst [smem:[#allocation17_spill]] %s1295_s3 }
   0x3   :  { %1304 = sst [smem:[#allocation18_spill]] %s1297_s5 }
   0x4   :  { %1305 = sst [smem:[#allocation19_spill]] %s1299_s7 }
   0x5   :  { %14 = vsyncpa [#allocation3], 0 }
   0x6   :  { %16 = vsyncpa [#allocation3 + $0x1], 0 }
   0x7   :  { %17 = vsyncpa [#allocation6], 0 }
   0x8   :  { %18 = vsyncpa [#allocation9], 0 }
   0x9   :  { %19 = vsyncpa [#allocation4], 0 }
   0xa   :  { %21 = vsyncpa [#allocation4 + $0x1], 0  ;;  %s1106_s30 = smov 0   ;;  %s1108_s10 = smov 0  }
   0xb   :  { %s1110_s11 = smov 0   ;;  %s1112_s12 = smov 0  }
   0xc LB: > { %s1306_s1 = sld [smem:[#allocation16_spill]]  ;;  %s1130_s16 = sadd.s32 4294967295, %s1048_s12   ;;  %s1048_s12 = sphi %s1112_s12, %s1321_s12   ;;  %s1044_s11 = sphi %s1110_s11, %s1320_s11   ;;  %s1040_s10 = sphi %s1108_s10, %s1319_s10   ;;  %s1036_s30 = sphi %s1106_s30, %s1318_s30  }
   0xd   : > { %p712_p0 = scmp.ge.s32.totalorder %s1048_s12, 1  ;;  %p48_p1 = scmp.eq.s32.totalorder %s1130_s16, 0 }
   0xe   : > { %p252_p2 = scmp.lt.s32.totalorder %s1048_s12, 3  ;;  %s1050_s18 = smov [#allocation5]  }
   0xf   : > { %s265_s19 = sshll.u32 %s1050_s18, 4  ;;  %s1308_s5 = sld [smem:[#allocation18_spill]]  ;;  %s266_s19 = int_to_ptr.vmem [resolvable:$true] %s265_s19 }
  0x10   : > { %p1135_p3 = pnand %p712_p0, %p252_p2  ;;  %s1310_s3 = sld [smem:[#allocation17_spill]] }
  0x11   : > { %s1051_s27 = smov [#allocation8]   ;;  %s1052_s29 = smov 128  }
  0x12   : > { %s263_s15 = sshll.u32 %s1306_s1, 4  ;;  %p751_p4 = pneg %p1135_p3  ;;  %s264_s15 = int_to_ptr.hbm [resolvable:$true] %s263_s15 }
  0x13   : > { %s299_s28 = sshll.u32 %s1051_s27, 4  ;;  %s1053_s13 = smov 8   ;;  %s300_s28 = int_to_ptr.vmem [resolvable:$true] %s299_s28 }
  0x14   : > { %p1147_p6 = pnand %p751_p4, %p48_p1  ;;  %s1311_s7 = sld [smem:[#allocation19_spill]] }
  0x15   : > { %s297_s22 = sshll.u32 %s1308_s5, 4  ;;  %s1054_s21 = smov [#allocation7]   ;;  %s298_s22 = int_to_ptr.hbm [resolvable:$true] %s297_s22 }
  0x16   : > { %s280_s26 = sshll.u32 %s1310_s3, 4  ;;  %s282_s24 = sshll.u32 %s1054_s21, 4  ;;  %s281_s26 = int_to_ptr.hbm [resolvable:$true] %s280_s26  ;;  %s283_s24 = int_to_ptr.vmem [resolvable:$true] %s282_s24 }
  0x17   : > { %754 = dma.hbm_to_vmem [thread:$0]  (!%p1147_p6), %s264_s15, 2048, %s266_s19, [#allocation6], %s1052_s29, %s1052_s29, %s1053_s13  }
  0x18   : > { %760 = dma.hbm_to_vmem [thread:$0]  (!%p1147_p6), %s298_s22, 2048, %s300_s28, [#allocation9], %s1052_s29, %s1052_s29, %s1053_s13  }
  0x19   : > { %757 = dma.hbm_to_vmem [thread:$0]  (!%p1147_p6), %s281_s26, 2048, %s283_s24, [#allocation6], %s1052_s29, %s1052_s29, %s1053_s13  }
  0x1a   : > { %s314_s20 = sshll.u32 %s1311_s7, 4  ;;  %s1055_s15 = smov [#allocation10]   ;;  %s315_s20 = int_to_ptr.hbm [resolvable:$true] %s314_s20 }
  0x1b   : > { %s316_s19 = sshll.u32 %s1055_s15, 4  ;;  %s711_s22 = sadd.s32 4294967294, %s1048_s12   ;;  %s317_s19 = int_to_ptr.vmem [resolvable:$true] %s316_s19 }
  0x1c   : > { %763 = dma.hbm_to_vmem [thread:$0]  (!%p1147_p6), %s315_s20, 2048, %s317_s19, [#allocation9], %s1052_s29, %s1052_s29, %s1053_s13  }
  0x1d   : > { %s1167_s25 = sadd.s32 1, %s1048_s12   ;;  %s34_s28 = sadd.s32 1, %s1044_s11 }
  0x1e   : > { %s31_s27 = ssub.s32 %s1048_s12, %s1167_s25  ;;  %p41_p8 = scmp.ne.s32.totalorder %s1044_s11, %s1040_s10 }
  0x1f   : > { %p32_p7 = scmp.eq.s32.totalorder %s31_s27, 0  ;;  %p42_p9 = scmp.eq.s32.totalorder %s1048_s12, 0 }
  0x20   : > { %p47_p10 = scmp.ne.s32.totalorder %s1040_s10, %s1036_s30  ;;  %p239_p13 = scmp.eq.s32.totalorder %s1130_s16, 1 }
  0x21   : > { %s1178_s26 = scalar_select %p32_p7, %s1044_s11, %s34_s28  }
  0x22   : > { %p1180_p11 = por %p42_p9, %p41_p8  ;;  %p1186_p12 = por %p48_p1, %p47_p10 }
  0x23   : > { %p245_p0 = scmp.eq.s32.totalorder %s711_s22, 1  ;;  %p776_p2 = scmp.lt.s32.totalorder %s1048_s12, 2 }
  0x24   : > { %s333_s29 = sand.u32 1, %s1044_s11   ;;  %p1193_p4 = por %p239_p13, %p41_p8 }
  0x25   : > { %p1197_p6 = por %p245_p0, %p47_p10  ;;  %s718_s20 = sshll.u32 %s333_s29, 3 }
  0x26   : > { %s719_s21 = sshll.u32 %s1048_s12, 3  ;;  %s337_s27 = scalar_lea.vmem [#allocation2], %s718_s20 }
  0x27   : > { %s341_s19 = scalar_lea.hbm %s1292_s0, %s719_s21  ;;  %s345_s28 = sshll.u32 %s337_s27, 4  ;;  %s346_s28 = int_to_ptr.vmem [resolvable:$true] %s345_s28 }
  0x28   : > { %s343_s1 = sshll.u32 %s341_s19, 4  ;;  %p1207_p7 = pnand %p776_p2, %p1180_p11  ;;  %s344_s1 = int_to_ptr.hbm [resolvable:$true] %s343_s1 }
  0x29   : > { %s334_s3 = scalar_lea.sflag [#allocation3], %s333_s29  ;;  %s944_s5 = sshra.s32 %s344_s1, 4  ;;  %s945_s5 = int_to_ptr.hbm [resolvable:$true] %s944_s5 }
  0x2a   : > { %s946_s7 = scalar_lea.hbm %s945_s5, 8  ;;  %p948_p9 = pneg %p1207_p7 }
  0x2b   : > { %p947_p8 = scmp.ne.s32.totalorder %s945_s5, %s946_s7  ;;  %s951_s24 = scalar_lea.hbm %s1292_s0, 16 }
  0x2c   : > { %p952_p11 = scmp.lt.s32.totalorder %s945_s5, %s1292_s0  ;;  %p953_p0 = scmp.lt.s32.totalorder %s951_s24, %s946_s7 }
  0x2d   : > { %p949_p10 = pnand %p948_p9, %p947_p8 }
  0x2e   : > { %p954_p2 = por %p953_p0, %p952_p11 }
  0x2f   : > { %p950_p13 = pneg %p949_p10 }
  0x31   : > { %p955_p5 = pnand %p954_p2, %p950_p13 }
  0x33   : > { %958 = shalt.err (!%p955_p5)
}
  0x34   : > { %767 = dma.hbm_to_vmem [thread:$0]  (!%p1207_p7), %s344_s1, 128, %s346_s28, %s334_s3  }
  0x35   : > { %354 = sbr.rel (%p1135_p3) target bundleno = 631 (0x277), region = 56  ;;  %s1224_s29 = sand.u32 (!%p1135_p3), 1, %s1040_s10  }
  0x36   : > { %s721_s19 = sshll.u32 (!%p1135_p3), %s1224_s29, 3  ;;  %s357_s27 = scalar_lea.sflag (!%p1135_p3), [#allocation3], %s1224_s29 }
  0x37   : > { %s1230_s5 = scalar_lea.vmem (!%p1135_p3), [#allocation2], %s721_s19 }
  0x3a   : > { %1019 = dma.done.wait (%p1186_p12), %s357_s27, 128  }
  0x3b   : > { %1021 = vsyncadd (%p1186_p12), %s357_s27, 4294967168 }
  0x3c   : > { %1023 = dma.done.wait (%p48_p1), [#allocation6], 4096  }
  0x3d   : > { %1025 = vsyncadd (%p48_p1), [#allocation6], 4294963200 }
  0x3e   : > { %1027 = dma.done.wait (%p48_p1), [#allocation9], 4096  }
  0x3f   : > { %1029 = vsyncadd (%p48_p1), [#allocation9], 4294963200  ;;  %v432_v0 = vld [vmem:[#allocation5 + $0x78] sm:$0xff]  ;;  %v431_v1 = vld [vmem:[#allocation5 + $0x70] sm:$0xff]  ;;  %s728_s22 = sshll.u32 %s1130_s16, 3  ;;  %s415_s27 = scalar_lea.vmem [#allocation11], %s721_s19 }
  0x40   : > { %437 = vmatpush.msra.mxu0 %v432_v0  ;;  %v430_v2 = vld [vmem:[#allocation5 + $0x68] sm:$0xff]  ;;  %v429_v3 = vld [vmem:[#allocation5 + $0x60] sm:$0xff]  ;;  %v475_v4 = vld [vmem:[#allocation7 + $0x78] sm:$0xff]  ;;  %s598_s24 = scalar_lea.hbm %s1301_s9, %s728_s22  ;;  %s588_s3 = scalar_lea.sflag [#allocation4], %s1224_s29 }
  0x41   : > { %v428_v5 = vld [vmem:[#allocation5 + $0x58] sm:$0xff]  ;;  %480 = vmatpush.msra.mxu1 %v475_v4  ;;  %v474_v6 = vld [vmem:[#allocation7 + $0x70] sm:$0xff]  ;;  %v473_v7 = vld [vmem:[#allocation7 + $0x68] sm:$0xff]  ;;  %s602_s1 = sshll.u32 %s598_s24, 4  ;;  %s994_s28 = scalar_lea.hbm %s1301_s9, 16  ;;  %s603_s1 = int_to_ptr.hbm [resolvable:$true] %s602_s1 }
  0x42   : > { %438 = vmatpush.msra.mxu0 %v431_v1  ;;  %v427_v8 = vld [vmem:[#allocation5 + $0x50] sm:$0xff]  ;;  %v472_v9 = vld [vmem:[#allocation7 + $0x60] sm:$0xff]  ;;  %v426_v10 = vld [vmem:[#allocation5 + $0x48] sm:$0xff]  ;;  %s988_s16 = sshra.s32 %s603_s1, 4  ;;  %s989_s16 = int_to_ptr.hbm [resolvable:$true] %s988_s16 }
  0x43   : > { %481 = vmatpush.msra.mxu1 %v474_v6  ;;  %v471_v11 = vld [vmem:[#allocation7 + $0x58] sm:$0xff]  ;;  %v425_v12 = vld [vmem:[#allocation5 + $0x40] sm:$0xff]  ;;  %v470_v13 = vld [vmem:[#allocation7 + $0x50] sm:$0xff]  ;;  %s990_s7 = scalar_lea.hbm %s989_s16, 8  ;;  %p995_p12 = scmp.lt.s32.totalorder %s989_s16, %s1301_s9 }
  0x44   : > { %439 = vmatpush.msra.mxu0 %v430_v2  ;;  %v424_v14 = vld [vmem:[#allocation5 + $0x38] sm:$0xff]  ;;  %v469_v15 = vld [vmem:[#allocation7 + $0x48] sm:$0xff]  ;;  %v423_v16 = vld [vmem:[#allocation5 + $0x30] sm:$0xff]  ;;  %p991_p1 = scmp.ne.s32.totalorder %s989_s16, %s990_s7  ;;  %p996_p7 = scmp.lt.s32.totalorder %s994_s28, %s990_s7 }
  0x45   : > { %482 = vmatpush.msra.mxu1 %v473_v7  ;;  %v468_v17 = vld [vmem:[#allocation7 + $0x40] sm:$0xff]  ;;  %v422_v18 = vld [vmem:[#allocation5 + $0x28] sm:$0xff]  ;;  %v467_v19 = vld [vmem:[#allocation7 + $0x38] sm:$0xff] }
  0x46   : > { %440 = vmatpush.msra.mxu0 %v429_v3  ;;  %v421_v20 = vld [vmem:[#allocation5 + $0x20] sm:$0xff]  ;;  %v466_v21 = vld [vmem:[#allocation7 + $0x30] sm:$0xff]  ;;  %v420_v22 = vld [vmem:[#allocation5 + $0x18] sm:$0xff]  ;;  %p992_p3 = pnand %p991_p1, %p1193_p4  ;;  %p997_p8 = por %p996_p7, %p995_p12 }
  0x47   : > { %483 = vmatpush.msra.mxu1 %v472_v9  ;;  %v465_v23 = vld [vmem:[#allocation7 + $0x28] sm:$0xff]  ;;  %v419_v24 = vld [vmem:[#allocation5 + $0x10] sm:$0xff]  ;;  %v464_v25 = vld [vmem:[#allocation7 + $0x20] sm:$0xff] }
  0x48   : > { %441 = vmatpush.msra.mxu0 %v428_v5  ;;  %v418_v26 = vld [vmem:[#allocation5 + $0x8] sm:$0xff]  ;;  %v463_v27 = vld [vmem:[#allocation7 + $0x18] sm:$0xff]  ;;  %v417_v28 = vld [vmem:[#allocation5] sm:$0xff]  ;;  %p993_p5 = pneg %p992_p3 }
  0x49   : > { %484 = vmatpush.msra.mxu1 %v471_v11  ;;  %v416_v29 = vld [vmem:[%s1230_s5] sm:$0xff]  ;;  %v461_v31 = vld [vmem:[#allocation7 + $0x8] sm:$0xff]  ;;  %v460_v32 = vld [vmem:[#allocation7] sm:$0xff]  ;;  %s600_s5 = sshll.u32 %s415_s27, 4  ;;  %s601_s5 = int_to_ptr.vmem [resolvable:$true] %s600_s5 }
  0x4a   : > { %442 = vmatpush.msra.mxu0 %v427_v8  ;;  %v462_v30 = vld [vmem:[#allocation7 + $0x10] sm:$0xff]  ;;  %v518_v33 = vld [vmem:[#allocation8 + $0x78] sm:$0xff]  ;;  %v516_v35 = vld [vmem:[#allocation8 + $0x68] sm:$0xff]  ;;  %p998_p9 = pnand %p997_p8, %p993_p5 }
  0x4b   : > { %485 = vmatpush.msra.mxu1 %v470_v13  ;;  %v517_v34 = vld [vmem:[#allocation8 + $0x70] sm:$0xff]  ;;  %523 = vmatpush.msra.mxu2 %v518_v33  ;;  %v515_v36 = vld [vmem:[#allocation8 + $0x60] sm:$0xff]  ;;  %v514_v37 = vld [vmem:[#allocation8 + $0x58] sm:$0xff] }
  0x4c   : > { %443 = vmatpush.msra.mxu0 %v426_v10  ;;  %v513_v38 = vld [vmem:[#allocation8 + $0x50] sm:$0xff]  ;;  %v512_v39 = vld [vmem:[#allocation8 + $0x48] sm:$0xff]  ;;  %v511_v40 = vld [vmem:[#allocation8 + $0x40] sm:$0xff] }
  0x4d   : > { %486 = vmatpush.msra.mxu1 %v469_v15  ;;  %524 = vmatpush.msra.mxu2 %v517_v34  ;;  %v510_v41 = vld [vmem:[#allocation8 + $0x38] sm:$0xff]  ;;  %v509_v42 = vld [vmem:[#allocation8 + $0x30] sm:$0xff]  ;;  %v508_v43 = vld [vmem:[#allocation8 + $0x28] sm:$0xff] }
  0x4e   : > { %444 = vmatpush.msra.mxu0 %v425_v12  ;;  %v507_v44 = vld [vmem:[#allocation8 + $0x20] sm:$0xff]  ;;  %v506_v45 = vld [vmem:[#allocation8 + $0x18] sm:$0xff]  ;;  %v820_v46 = vld [vmem:[%s1294_s2] ss:$0 sm:$0xff] }
  0x4f   : > { %487 = vmatpush.msra.mxu1 %v468_v17  ;;  %525 = vmatpush.msra.mxu2 %v516_v35  ;;  %v505_v51 = vld [vmem:[#allocation8 + $0x10] sm:$0xff]  ;;  %v504_v52 = vld [vmem:[#allocation8 + $0x8] sm:$0xff]  ;;  %v503_v53 = vld [vmem:[#allocation8] sm:$0xff] }
  0x50   : > { %445 = vmatpush.msra.mxu0 %v424_v14  ;;  %v561_v54 = vld [vmem:[#allocation10 + $0x78] sm:$0xff]  ;;  %v560_v55 = vld [vmem:[#allocation10 + $0x70] sm:$0xff]  ;;  %v559_v56 = vld [vmem:[#allocation10 + $0x68] sm:$0xff] }
  0x51   : > { %488 = vmatpush.msra.mxu1 %v467_v19  ;;  %526 = vmatpush.msra.mxu2 %v515_v36  ;;  %v558_v57 = vld [vmem:[#allocation10 + $0x60] sm:$0xff]  ;;  %v557_v58 = vld [vmem:[#allocation10 + $0x58] sm:$0xff]  ;;  %v556_v59 = vld [vmem:[#allocation10 + $0x50] sm:$0xff] }
  0x52   : > { %446 = vmatpush.msra.mxu0 %v423_v16  ;;  %566 = vmatpush.msra.mxu3 %v561_v54  ;;  %v555_v60 = vld [vmem:[#allocation10 + $0x48] sm:$0xff]  ;;  %v554_v61 = vld [vmem:[#allocation10 + $0x40] sm:$0xff]  ;;  %v553_v62 = vld [vmem:[#allocation10 + $0x38] sm:$0xff] }
  0x53   : > { %489 = vmatpush.msra.mxu1 %v466_v21  ;;  %527 = vmatpush.msra.mxu2 %v514_v37  ;;  %v552_v63 = vld [vmem:[#allocation10 + $0x30] sm:$0xff]  ;;  %v551_v0 = vld [vmem:[#allocation10 + $0x28] sm:$0xff]  ;;  %v550_v1 = vld [vmem:[#allocation10 + $0x20] sm:$0xff] }
  0x54   : > { %447 = vmatpush.msra.mxu0 %v422_v18  ;;  %567 = vmatpush.msra.mxu3 %v560_v55  ;;  %v549_v2 = vld [vmem:[#allocation10 + $0x18] sm:$0xff]  ;;  %v821_v3 = vld [vmem:[%s1296_s4] ss:$0 sm:$0xff]  ;;  %v547_v9 = vld [vmem:[#allocation10 + $0x8] sm:$0xff] }
  0x55   : > { %490 = vmatpush.msra.mxu1 %v465_v23  ;;  %528 = vmatpush.msra.mxu2 %v513_v38  ;;  %v548_v8 = vld [vmem:[#allocation10 + $0x10] sm:$0xff]  ;;  %v546_v10 = vld [vmem:[#allocation10] sm:$0xff] }
  0x56   : > { %448 = vmatpush.msra.mxu0 %v421_v20  ;;  %568 = vmatpush.msra.mxu3 %v559_v56  ;;  %v822_v11 = vld [vmem:[%s1298_s6] ss:$0 sm:$0xff] }
  0x57   : > { %491 = vmatpush.msra.mxu1 %v464_v25  ;;  %529 = vmatpush.msra.mxu2 %v512_v39  ;;  %v823_v16 = vld [vmem:[%s1300_s8] ss:$0 sm:$0xff] }
  0x58   : > { %449 = vmatpush.msra.mxu0 %v420_v22  ;;  %569 = vmatpush.msra.mxu3 %v558_v57 }
  0x59   : > { %492 = vmatpush.msra.mxu1 %v463_v27  ;;  %530 = vmatpush.msra.mxu2 %v511_v40 }
  0x5a   : > { %450 = vmatpush.msra.mxu0 %v419_v24  ;;  %570 = vmatpush.msra.mxu3 %v557_v58 }
  0x5b   : > { %493 = vmatpush.msra.mxu1 %v462_v30  ;;  %531 = vmatpush.msra.mxu2 %v510_v41 }
  0x5c   : > { %451 = vmatpush.msra.mxu0 %v418_v26  ;;  %571 = vmatpush.msra.mxu3 %v556_v59 }
  0x5d   : > { %494 = vmatpush.msra.mxu1 %v461_v31  ;;  %532 = vmatpush.msra.mxu2 %v509_v42 }
  0x5e   : > { %452 = vmatpush.msra.mxu0 %v417_v28  ;;  %572 = vmatpush.msra.mxu3 %v555_v60 }
  0x5f   : > { %453 = vmatmul.f32.vlgmr.msra.gmra.mxu0 %v416_v29  ;;  %495 = vmatpush.msra.mxu1 %v460_v32 }
  0x60   : > { %533 = vmatpush.msra.mxu2 %v508_v43  ;;  %573 = vmatpush.msra.mxu3 %v554_v61 }
  0x62   : > { %534 = vmatpush.msra.mxu2 %v507_v44  ;;  %574 = vmatpush.msra.mxu3 %v553_v62 }
  0x64   : > { %535 = vmatpush.msra.mxu2 %v506_v45  ;;  %575 = vmatpush.msra.mxu3 %v552_v63 }
  0x66   : > { %536 = vmatpush.msra.mxu2 %v505_v51  ;;  %576 = vmatpush.msra.mxu3 %v551_v0 }
  0x68   : > { %537 = vmatpush.msra.mxu2 %v504_v52  ;;  %577 = vmatpush.msra.mxu3 %v550_v1 }
  0x6a   : > { %538 = vmatpush.msra.mxu2 %v503_v53  ;;  %578 = vmatpush.msra.mxu3 %v549_v2 }
  0x6c   : > { %579 = vmatpush.msra.mxu3 %v548_v8 }
  0x6e   : > { %580 = vmatpush.msra.mxu3 %v547_v9 }
  0x70   : > { %581 = vmatpush.msra.mxu3 %v546_v10 }
  0xdc   : > { %v454_v47 = vpop.f32.mrf.mxu0 }
  0xdd   : > { %v455_v48 = vadd.f32 %v820_v46, %v454_v47 }
  0xdf   : > { %vm457_vm0 = vcmp.ge.f32.partialorder %v455_v48, 0.0  ;;  %v458_v49 = vmul.f32 0.01, %v455_v48 }
  0xe1   : > { %v459_v50 = vsel %vm457_vm0, %v455_v48, %v458_v49 }
  0xe2   : > { %496 = vmatmul.f32.vlgmr.msra.gmra.mxu1 %v459_v50 }
 0x15f   : > { %v497_v4 = vpop.f32.mrf.mxu1 }
 0x160   : > { %v498_v5 = vadd.f32 %v821_v3, %v497_v4 }
 0x162   : > { %vm500_vm1 = vcmp.ge.f32.partialorder %v498_v5, 0.0  ;;  %v501_v6 = vmul.f32 0.01, %v498_v5 }
 0x164   : > { %v502_v7 = vsel %vm500_vm1, %v498_v5, %v501_v6 }
 0x165   : > { %539 = vmatmul.f32.vlgmr.msra.gmra.mxu2 %v502_v7 }
 0x1e8   : > { %v540_v12 = vpop.f32.mrf.mxu2 }
 0x1e9   : > { %v541_v13 = vadd.f32 %v822_v11, %v540_v12 }
 0x1eb   : > { %vm543_vm2 = vcmp.ge.f32.partialorder %v541_v13, 0.0  ;;  %v544_v14 = vmul.f32 0.01, %v541_v13 }
 0x1ed   : > { %v545_v15 = vsel %vm543_vm2, %v541_v13, %v544_v14 }
 0x1ee   : > { %582 = vmatmul.f32.vlgmr.msra.gmra.mxu3 %v545_v15 }
 0x271   : > { %v583_v17 = vpop.f32.mrf.mxu3 }
 0x272   : > { %v584_v18 = vadd.f32 %v823_v16, %v583_v17 }
 0x274   : > { %586 = vst [vmem:[%s415_s27] sm:$0xff] %v584_v18 }
 0x275   : > { %1001 = shalt.err (!%p998_p9)
}
 0x276   : > { %749 = dma.vmem_to_hbm [thread:$0]  (%p1193_p4), %s601_s5, 128, %s603_s1, %s588_s3  }
 0x277 PF: > { %s614_s29 = sand.u32 1, %s1036_s30   ;;  %p1317_p10 = scmp.ge.s32.totalorder %s1048_s12, 2 }
 0x278   : > { %s615_s20 = scalar_lea.sflag [#allocation4], %s614_s29 }
 0x279   : > { %p769_p13 = pnand %p1317_p10, %p1197_p6 }
 0x27b   : > { %p770_p11 = pneg %p769_p13 }
 0x27d   : > { %1031 = dma.done.wait (%p770_p11), %s615_s20, 128  }
 0x27e   : > { %1033 = vsyncadd (%p770_p11), %s615_s20, 4294967168  ;;  %p24_p0 = scmp.ge.s32.totalorder %s1167_s25, 4   ;;  %s1318_s30 = smov %s1040_s10 }
 0x27f   : > { %s1319_s10 = smov %s1044_s11  ;;  %s1320_s11 = smov %s1178_s26 }
 0x280   : > { %s1321_s12 = smov %s1167_s25  ;;  %26 = sbr.rel (!%p24_p0) target bundleno = 12 (0xc), region = 117 }
 0x285   :  { %621 = vsyncpa [#allocation3], 1 }
 0x286   :  { %623 = vsyncpa [#allocation3 + $0x1], 1 }
 0x287   :  { %624 = vsyncpa [#allocation6], 1 }
 0x288   :  { %625 = vsyncpa [#allocation9], 1 }
 0x289   :  { %626 = vsyncpa [#allocation4], 1 }
 0x28a   :  { %628 = vsyncpa [#allocation4 + $0x1], 1 }

</bundles_post_ra>
